<compile_context>
chip_gen: v7x
topology: tpu7x:2x2x1
jax: 0.10.0
libtpu: 0.0.40
codegen_flags: <defaults>
</compile_context>

<pallas_src>
import functools
import math

import jax
import jax.numpy as jnp
from jax import lax
from jax.experimental import pallas as pl
from jax.experimental.pallas import tpu as pltpu


def _kernel_size(channel, gamma=2, b=1):
    """Mirror of the PyTorch module's kernel-size rule."""
    t = int(abs((math.log(channel, 2) + b) / gamma))
    k = t if t % 2 else t + 1
    return max(3, k)


def _round_up(x, m):
    return (x + m - 1) // m * m


@functools.lru_cache(maxsize=None)
def _vmem_capacity_bytes():
    """Per-generation VMEM capacity (v5e/v6e 128 MiB, v7x 64 MiB)."""
    try:
        return int(pltpu.get_tpu_info().vmem_capacity_bytes)
    except Exception:
        return 64 << 20  # conservative fallback (v7x-sized)


def _eca_kernel(w_ref, x_ref, o_ref, acc_ref, *, k, pad, channels, hw, thw, needs_mask):
    """One (batch-block, spatial-tile) grid step.

    w_ref  : (k,)          f32 conv taps in SMEM
    x_ref  : (TB, C, THW)  streamed input tile in VMEM
    o_ref  : (TB, 1, C)    attention weights for this batch block (written on last step)
    acc_ref: (TB, C)       f32 running sum, resident across the spatial grid axis
    """
    s = pl.program_id(1)
    n_s = pl.num_programs(1)

    @pl.when(s == 0)
    def _init():
        acc_ref[...] = jnp.zeros_like(acc_ref)

    x = x_ref[...].astype(jnp.float32)  # (TB, C, THW)

    if needs_mask:
        # Only the LAST spatial tile is ragged; every other tile accumulates mask-free.
        @pl.when(s < n_s - 1)
        def _acc_full():
            acc_ref[...] += jnp.sum(x, axis=-1)

        @pl.when(s == n_s - 1)
        def _acc_masked():
            lane = lax.broadcasted_iota(jnp.int32, x.shape, 2)
            xm = jnp.where(s * thw + lane < hw, x, 0.0)
            acc_ref[...] += jnp.sum(xm, axis=-1)
    else:
        acc_ref[...] += jnp.sum(x, axis=-1)

    @pl.when(s == n_s - 1)
    def _finalize():
        pooled = acc_ref[...] * jnp.float32(1.0 / hw)            # global avg pool (TB, C)

        # k-tap 'same' conv across channels as k shifted adds on the pooled row:
        # O(k*C) VPU work, zero HBM traffic, no (C,C) transients, no M=1 matmul.
        zpad = jnp.zeros((pooled.shape[0], pad), jnp.float32)
        padded = jnp.concatenate([zpad, pooled, zpad], axis=-1)  # (TB, C + 2*pad)
        y = jnp.zeros_like(pooled)
        for t in range(k):
            y = y + w_ref[t] * padded[:, t:t + channels]

        o_ref[...] = jax.nn.sigmoid(y).reshape(o_ref.shape).astype(o_ref.dtype)


@functools.partial(jax.jit, static_argnames=("tile_budget_bytes",))
def channel_attention(x, conv_w, *, tile_budget_bytes=None):
    """x: (B, C, H, W).  conv_w: (k,) conv1d taps.  Returns (B, C, 1, 1) attention map.

    `tile_budget_bytes` optionally overrides the per-buffer VMEM budget (testing).
    Note: if the surrounding model is bf16, pass bf16 `x` — the kernel already
    accumulates the pooling sum in f32, and bf16 halves the HBM traffic.
    """
    B, C, H, W = x.shape
    HW = H * W
    k = int(conv_w.shape[0])
    pad = (k - 1) // 2

    itemsize = jnp.dtype(x.dtype).itemsize
    sublane = {4: 8, 2: 16, 1: 32}.get(itemsize, 8)
    c_pad = _round_up(C, sublane)

    vmem_cap = _vmem_capacity_bytes()
    # Per single-buffer tile budget (pipeline double-buffers it):
    #   v7x (64 MiB)  -> 16 MiB/buffer (32 MiB streamed)
    #   v5e/v6e (128) -> 32 MiB/buffer (64 MiB streamed)
    tile_budget = tile_budget_bytes if tile_budget_bytes is not None else vmem_cap // 4

    row_bytes = c_pad * _round_up(HW, 128) * itemsize  # one full (C, HW) row in VMEM

    if row_bytes <= tile_budget:
        # Whole image fits in one tile; batch rows to amortize per-step overhead.
        thw = HW
        needs_mask = False
        target = 4 << 20
        tb = 1
        for d in range(1, B + 1):
            if B % d:
                continue
            if d * row_bytes > tile_budget:
                break
            if B >= 2 and B // d < 2:
                break  # keep >= 2 batch blocks so megacore can split the batch axis
            tb = d
            if d * row_bytes >= target:
                break
    else:
        # Stream the spatial reduction; fill the budget (no artificial lane cap).
        tb = 1
        thw = (tile_budget // (c_pad * itemsize) // 128) * 128
        thw = max(128, thw)
        needs_mask = (HW % thw) != 0

    n_s = pl.cdiv(HW, thw)

    x3 = x.reshape(B, C, HW)
    w32 = conv_w.astype(jnp.float32)

    # Explicit VMEM limit from the actual footprint: double-buffered input/output,
    # the resident accumulator, plus headroom for finalize transients / compiler scratch.
    tile_bytes = tb * c_pad * _round_up(thw, 128) * itemsize
    out_bytes = tb * _round_up(C, 128) * itemsize
    vmem_limit = 2 * tile_bytes + 2 * out_bytes
    vmem_limit += _round_up(tb, 8) * _round_up(C, 128) * 4
    vmem_limit += 4 << 20
    vmem_limit = int(min(max(vmem_limit, 16 << 20), vmem_cap - (8 << 20)))

    kernel = functools.partial(
        _eca_kernel, k=k, pad=pad, channels=C, hw=HW, thw=thw, needs_mask=needs_mask)

    out = pl.pallas_call(
        kernel,
        out_shape=jax.ShapeDtypeStruct((B, 1, C), x.dtype),
        grid=(B // tb, n_s),                                        # reduction axis last
        in_specs=[
            pl.BlockSpec(memory_space=pltpu.MemorySpace.SMEM),      # conv taps (k,) in SMEM
            pl.BlockSpec((tb, C, thw), lambda bi, si: (bi, 0, si)),  # streamed input tiles
        ],
        out_specs=pl.BlockSpec((tb, 1, C), lambda bi, si: (bi, 0, 0)),
        scratch_shapes=[pltpu.VMEM((tb, C), jnp.float32)],          # pooling accumulator
        compiler_params=pltpu.CompilerParams(
            dimension_semantics=("parallel", "arbitrary"),          # batch across cores
            vmem_limit_bytes=vmem_limit,
        ),
    )(w32, x3)
    return out.reshape(B, C, 1, 1)


def _reference(x, conv_w):
    """Plain-JAX reference mirroring the PyTorch forward."""
    B, C, H, W = x.shape
    k = conv_w.shape[0]
    pad = (k - 1) // 2
    pooled = jnp.mean(x.astype(jnp.float32), axis=(2, 3))       # (B, C)
    padded = jnp.pad(pooled, ((0, 0), (pad, pad)))              # zero 'same' padding
    conv = jnp.zeros_like(pooled)
    for j in range(k):
        conv = conv + conv_w[j] * padded[:, j:j + C]
    return jax.nn.sigmoid(conv).astype(x.dtype).reshape(B, C, 1, 1)


if __name__ == "__main__":
    key = jax.random.PRNGKey(0)

    # (shape, tile_budget_override) — the override forces the streamed / ragged paths
    # at small test shapes without needing huge images.
    test_cases = [
        ((2, 4, 16, 16), None),        # spec shape: single tile, TB=1
        ((4, 4, 16, 16), None),        # row batching: TB=2, grid (2, 1)
        ((2, 16, 128, 128), None),     # larger single tile per row
        ((2, 8, 96, 96), 64 << 10),    # forced streaming: 5 spatial tiles, ragged last tile
    ]
    for (B, C, H, W), budget in test_cases:
        key, kx, kw = jax.random.split(key, 3)
        x = jax.random.normal(kx, (B, C, H, W), dtype=jnp.float32)

        k_size = _kernel_size(C)
        # Deterministic Conv1d weight init (PyTorch default U(-1/sqrt(fan_in), 1/sqrt(fan_in)))
        bound = 1.0 / math.sqrt(1 * k_size)
        conv_w = jax.random.uniform(kw, (k_size,), minval=-bound, maxval=bound,
                                    dtype=jnp.float32)

        y = jax.block_until_ready(channel_attention(x, conv_w, tile_budget_bytes=budget))
        y_ref = _reference(x, conv_w)
        assert y.shape == (B, C, 1, 1)
        assert jnp.allclose(y, y_ref, atol=1e-5, rtol=1e-5), (B, C, H, W)

    print("KERNEL_OK")
</pallas_src>

<mosaic_0001>
module attributes {stable_mosaic.version = 11 : i64} {
  func.func @_eca_kernel(%arg0: i32, %arg1: i32, %arg2: memref<3xf32, #tpu.memory_space<smem>>, %arg3: memref<1x4x256xf32, #tpu.memory_space<vmem>>, %arg4: memref<1x1x4xf32, #tpu.memory_space<vmem>>, %arg5: memref<1x4xf32, #tpu.memory_space<vmem>>) attributes {dimension_semantics = [#tpu.dimension_semantics<parallel>, #tpu.dimension_semantics<arbitrary>], iteration_bounds = array<i64: 2, 1>, scalar_prefetch = 0 : i64, scratch_operands = 1 : i64, tpu.core_type = #tpu.core_type<tc>, window_params = [{transform_indices = @transform_0, window_bounds = array<i64: 3>}, {transform_indices = @transform_1, window_bounds = array<i64: 1, 4, 256>}, {transform_indices = @transform_2, window_bounds = array<i64: 1, 1, 4>}]} {
    %c0_i32 = arith.constant 0 : i32
    %0 = arith.cmpi eq, %arg1, %c0_i32 : i32
    %1 = arith.extui %0 : i1 to i32
    %c0_i32_0 = arith.constant 0 : i32
    %2 = arith.cmpi ne, %1, %c0_i32_0 : i32
    scf.if %2 {
      %cst_9 = arith.constant 0.000000e+00 : f32
      %11 = vector.broadcast %cst_9 : f32 to vector<1x4xf32>
      %c0_10 = arith.constant 0 : index
      %c0_11 = arith.constant 0 : index
      %12 = vector.load %arg5[%c0_10, %c0_11] : memref<1x4xf32, #tpu.memory_space<vmem>>, vector<1x4xf32>
      tpu.vector_store %arg5[%c0_10, %c0_11], %11 {strides = array<i32>} : memref<1x4xf32, #tpu.memory_space<vmem>>, vector<1x4xf32>,
    } else {
    }
    %c0 = arith.constant 0 : index
    %c0_1 = arith.constant 0 : index
    %c0_2 = arith.constant 0 : index
    %3 = vector.load %arg3[%c0, %c0_1, %c0_2] : memref<1x4x256xf32, #tpu.memory_space<vmem>>, vector<1x4x256xf32>
    %c0_3 = arith.constant 0 : index
    %c0_4 = arith.constant 0 : index
    %4 = vector.load %arg5[%c0_3, %c0_4] : memref<1x4xf32, #tpu.memory_space<vmem>>, vector<1x4xf32>
    %cst = arith.constant dense<0.000000e+00> : vector<1x4xf32>
    %5 = vector.multi_reduction <add>, %3, %cst [2] : vector<1x4x256xf32> to vector<1x4xf32>
    %6 = arith.addf %4, %5 : vector<1x4xf32>
    %c0_5 = arith.constant 0 : index
    %c0_6 = arith.constant 0 : index
    %7 = vector.load %arg5[%c0_5, %c0_6] : memref<1x4xf32, #tpu.memory_space<vmem>>, vector<1x4xf32>
    tpu.vector_store %arg5[%c0_5, %c0_6], %6 {strides = array<i32>} : memref<1x4xf32, #tpu.memory_space<vmem>>, vector<1x4xf32>,
    %c0_i32_7 = arith.constant 0 : i32
    %8 = arith.cmpi eq, %arg1, %c0_i32_7 : i32
    %9 = arith.extui %8 : i1 to i32
    %c0_i32_8 = arith.constant 0 : i32
    %10 = arith.cmpi ne, %9, %c0_i32_8 : i32
    scf.if %10 {
      %c0_9 = arith.constant 0 : index
      %c0_10 = arith.constant 0 : index
      %11 = vector.load %arg5[%c0_9, %c0_10] : memref<1x4xf32, #tpu.memory_space<vmem>>, vector<1x4xf32>
      %cst_11 = arith.constant 3.906250e-03 : f32
      %12 = vector.broadcast %cst_11 : f32 to vector<1x4xf32>
      %13 = arith.mulf %11, %12 : vector<1x4xf32>
      %cst_12 = arith.constant 0.000000e+00 : f32
      %14 = vector.broadcast %cst_12 : f32 to vector<1x1xf32>
      %15 = tpu.concatenate %14, %13, %14 in 1 : vector<1x1xf32>, vector<1x4xf32>, vector<1x1xf32> -> vector<1x6xf32>
      %cst_13 = arith.constant 0.000000e+00 : f32
      %16 = vector.broadcast %cst_13 : f32 to vector<1x4xf32>
      %c0_14 = arith.constant 0 : index
      %17 = memref.load %arg2[%c0_14] : memref<3xf32, #tpu.memory_space<smem>>
      %18 = vector.extract_strided_slice %15 {offsets = [0, 0], sizes = [1, 4], strides = [1, 1]} : vector<1x6xf32> to vector<1x4xf32>
      %19 = vector.broadcast %17 : f32 to vector<1x4xf32>
      %20 = arith.mulf %19, %18 : vector<1x4xf32>
      %21 = arith.addf %16, %20 : vector<1x4xf32>
      %c1 = arith.constant 1 : index
      %22 = memref.load %arg2[%c1] : memref<3xf32, #tpu.memory_space<smem>>
      %23 = vector.extract_strided_slice %15 {offsets = [0, 1], sizes = [1, 4], strides = [1, 1]} : vector<1x6xf32> to vector<1x4xf32>
      %24 = vector.broadcast %22 : f32 to vector<1x4xf32>
      %25 = arith.mulf %24, %23 : vector<1x4xf32>
      %26 = arith.addf %21, %25 : vector<1x4xf32>
      %c2 = arith.constant 2 : index
      %27 = memref.load %arg2[%c2] : memref<3xf32, #tpu.memory_space<smem>>
      %28 = vector.extract_strided_slice %15 {offsets = [0, 2], sizes = [1, 4], strides = [1, 1]} : vector<1x6xf32> to vector<1x4xf32>
      %29 = vector.broadcast %27 : f32 to vector<1x4xf32>
      %30 = arith.mulf %29, %28 : vector<1x4xf32>
      %31 = arith.addf %26, %30 : vector<1x4xf32>
      %32 = arith.negf %31 : vector<1x4xf32>
      %33 = math.exp %32 : vector<1x4xf32>
      %cst_15 = arith.constant 1.000000e+00 : f32
      %34 = vector.broadcast %cst_15 : f32 to vector<1x4xf32>
      %35 = arith.addf %34, %33 : vector<1x4xf32>
      %36 = arith.divf %34, %35 : vector<1x4xf32>
      %37 = vector.shape_cast %36 : vector<1x4xf32> to vector<1x1x4xf32>
      %c0_16 = arith.constant 0 : index
      %c0_17 = arith.constant 0 : index
      %c0_18 = arith.constant 0 : index
      %38 = vector.load %arg4[%c0_16, %c0_17, %c0_18] : memref<1x1x4xf32, #tpu.memory_space<vmem>>, vector<1x1x4xf32>
      tpu.vector_store %arg4[%c0_16, %c0_17, %c0_18], %37 {strides = array<i32>} : memref<1x1x4xf32, #tpu.memory_space<vmem>>, vector<1x1x4xf32>,
    } else {
    }
    return
  }
  func.func @transform_0(%arg0: i32, %arg1: i32) -> i32 {
    %c0_i32 = arith.constant 0 : i32
    %c0_i32_0 = arith.constant 0 : i32
    return %c0_i32 : i32
  }
  func.func @transform_1(%arg0: i32, %arg1: i32) -> (i32, i32, i32) {
    %c0_i32 = arith.constant 0 : i32
    %c0_i32_0 = arith.constant 0 : i32
    return %arg0, %c0_i32, %arg1 : i32, i32, i32
  }
  func.func @transform_2(%arg0: i32, %arg1: i32) -> (i32, i32, i32) {
    %c0_i32 = arith.constant 0 : i32
    %c0_i32_0 = arith.constant 0 : i32
    %c0_i32_1 = arith.constant 0 : i32
    return %arg0, %c0_i32, %c0_i32_0 : i32, i32, i32
  }
}

</mosaic_0001>

<bundles_post_ra>
// kernel: channel_attention.1
= control target key start
LH: loop header
LB: loop body
LE: loop exit
PB: predicated region body
PF: predicated region fallthrough
CT: control target
= control target key end

     0   :  { %7 = vsyncpa [#allocation5], 0  ;;  %s758_s0 = inlined_call_operand.vmem [shape: f32[3], index: 0, kind: input, shape index: {}]   ;;  %s759_s1 = inlined_call_operand.vmem [shape: f32[2,4,256], index: 1, kind: input, shape index: {}]   ;;  %s760_s2 = inlined_call_operand.hbm [shape: f32[2,1,4], index: 2, kind: output, shape index: {}]  }
   0x1   :  { %8 = vsyncpa [#allocation4], 0 }
   0x2   :  { %10 = vsyncpa [#allocation4 + $0x1], 0  ;;  %s622_s9 = smov 0   ;;  %s624_s10 = smov 0  }
   0x3   :  { %s626_s11 = smov 0   ;;  %s628_s12 = smov 0  }
   0x4   :  { %s630_s13 = smov 0   ;;  %s632_s14 = smov 0  }
   0x5 LB: > { %s406_s15 = sadd.s32 4294967295, %s597_s14   ;;  %s407_s16 = sadd.s32 4294967294, %s597_s14   ;;  %s597_s14 = sphi %s632_s14, %s16_s14   ;;  %s593_s13 = sphi %s630_s13, %s769_s13   ;;  %s589_s12 = sphi %s628_s12, %s768_s12   ;;  %s585_s11 = sphi %s626_s11, %s767_s11   ;;  %s581_s10 = sphi %s624_s10, %s766_s10   ;;  %s577_s9 = sphi %s622_s9, %s765_s9  }
   0x6   : > { %s28_s17 = sadd.s32 1, %s593_s13  ;;  %s84_s18 = sadd.s32 1, %s585_s11 }
   0x7   : > { %p30_p0 = scmp.ge.s32.totalorder %s28_s17, 2  ;;  %p94_p1 = scmp.ne.s32.totalorder %s585_s11, %s581_s10 }
   0x8   : > { %p95_p2 = scmp.eq.s32.totalorder %s406_s15, 1  ;;  %p100_p3 = scmp.ne.s32.totalorder %s581_s10, %s577_s9 }
   0x9   : > { %s771_s17 = smov (%p30_p0, %s28_s17), 0  ;;  %p101_p5 = scmp.eq.s32.totalorder %s407_s16, 1 }
   0xa   : > { %p662_p4 = por %p95_p2, %p94_p1  ;;  %s81_s20 = ssub.s32 %s593_s13, %s771_s17 }
   0xb   : > { %p408_p6 = scmp.ge.s32.totalorder %s597_s14, 1  ;;  %p82_p7 = scmp.eq.s32.totalorder %s81_s20, 0 }
   0xc   : > { %p669_p8 = por %p101_p5, %p100_p3  ;;  %p108_p9 = scmp.lt.s32.totalorder %s597_s14, 3 }
   0xd   : > { %s675_s22 = scalar_select %p82_p7, %s585_s11, %s84_s18  }
   0xe   : > { %p677_p10 = pnand %p408_p6, %p108_p9  ;;  %p681_p11 = scmp.eq.s32.totalorder %s406_s15, 0 }
   0xf   : > { %s121_s27 = sshll.u32 %s758_s0, 4  ;;  %s122_s27 = int_to_ptr.vmem [resolvable:$true] %s121_s27 }
  0x10   : > { %p428_p12 = pneg %p677_p10  ;;  %s500_s28 = scalar_lea.vmem %s122_s27, 16 }
  0x11   : > { %p501_p0 = scmp.ne.s32.totalorder %s122_s27, %s500_s28  ;;  %p508_p5 = scmp.lt.s32.totalorder %s122_s27, %s122_s27 }
  0x12   : > { %p429_p13 = pnand %p681_p11, %p428_p12  ;;  %p509_p6 = scmp.lt.s32.totalorder %s500_s28, %s500_s28 }
  0x14   : > { %p502_p1 = pneg %p429_p13  ;;  %p510_p7 = por %p509_p6, %p508_p5 }
  0x16   : > { %p503_p2 = pnand %p502_p1, %p501_p0 }
  0x18   : > { %p504_p3 = pneg %p503_p2 }
  0x1a   : > { %p511_p9 = pnand %p510_p7, %p504_p3 }
  0x1c   : > { %514 = shalt.err (!%p511_p9)
}
  0x1d   : > { %s599_s29 = smov [#allocation3]   ;;  %147 = sbr.rel (%p677_p10) target bundleno = 631 (0x277), region = 28 }
  0x1e   : > { %431 = dma.vmem_to_smem (!%p429_p13), %s122_s27, 16, %s599_s29, [#allocation5]  }
  0x24   : > { %568 = dma.done.wait (%p681_p11), [#allocation5], 16  }
  0x25   : > { %570 = vsyncadd (%p681_p11), [#allocation5], 4294967280 }
  0x26   : > { %153 = sfence }
  0x27   : > { %p174_p12 = scmp.lt.s32.totalorder %s589_s12, 1  ;;  %vm194_vm0 = vcmask 1043456   ;;  %v600_v5 = vmov 0   ;;  %v201_v6 = vlaneseq  ;;  %vm187_vm1 = vcmask 24576   ;;  %s603_s7 = smov 1  }
  0x28   : > { %494 = vset.pattern.permute.xlu0 %v600_v5  ;;  %v601_v9 = vmov 0.0   ;;  %v602_v11 = vmov 1966171168   ;;  %s415_s8 = sld [smem:[#allocation3 + $0x1]]  ;;  %s416_s15 = sld [smem:[#allocation3 + $0x2]]  ;;  %vm281_vm2 = vcmask 7168  }
  0x29   : > { %s175_s30 = scalar_select %p174_p12, %s589_s12, 1  ;;  %v202_v7 = vshrl.u32 %v201_v6, 7  ;;  %v245_v8 = vand.u32 127, %v201_v6  ;;  %188 = vst.msk [vmem:[#allocation2] sm:$0x1] %vm187_vm1, %v601_v9  ;;  %v220_v12 = vunpack.c.l.s4 %v602_v11  ;;  %vm283_vm3 = vcmask 39936  }
  0x2a   : > { %s604_s16 = smov 127   ;;  %s605_s18 = smov 126  }
  0x2b   : > { %s421_s3 = sshll.u32 %s175_s30, 3  ;;  %v248_v10 = vsub.s32 %v245_v8, %v202_v7  ;;  %v221_v13 = vunpack.c.0.s8 %v220_v12  ;;  %v203_v14 = vsub.s32 0, %v202_v7  ;;  %v207_v15 = vsub.s32 1, %v202_v7  ;;  %s285_s20 = sld [smem:[#allocation3]] }
  0x2c   : > { %s181_s6 = scalar_lea.vmem %s759_s1, %s421_s3  ;;  %v211_v16 = vsub.s32 2, %v202_v7  ;;  %v215_v17 = vsub.s32 3, %v202_v7  ;;  %s171_s23 = sand.u32 1, %s581_s10  }
  0x2d   : > { %v189_v0 = vld [vmem:[%s181_s6] sm:$0xff]  ;;  %v224_v19 = vsub.s32 %v221_v13, %v202_v7  ;;  %s418_s24 = sshll.u32 %s589_s12, 4  ;;  %s172_s25 = scalar_lea.vmem [#allocation6], %s171_s23 }
  0x2e   : > { %v192_v1 = vcombine.high %v189_v0, %v189_v0  ;;  %v195_v2 = vsel %vm194_vm0, %v189_v0, 0.0  ;;  %v290_v39 = vstv %s415_s8  ;;  %v298_v44 = vstv %s416_s15  ;;  %s325_s26 = sshll.u32 %s172_s25, 4  ;;  %s710_s29 = scalar_lea.hbm %s760_s2, %s418_s24  ;;  %s712_s26 = int_to_ptr.vmem [resolvable:$true] %s325_s26 }
  0x2f   : > { %s313_s30 = scalar_lea.sflag [#allocation4], %s171_s23  ;;  %s515_s3 = scalar_lea.vmem %s712_s26, 16 }
  0x30   : > { %v196_v3 = vsel %vm194_vm0, %v192_v1, 0.0  ;;  %v190_v33 = vld [vmem:[#allocation2] sm:$0x1]  ;;  %p516_p10 = scmp.ne.s32.totalorder %s712_s26, %s515_s3  ;;  %s606_s12 = smov [#allocation6]  }
  0x31   : > { %v197_v4 = vadd.f32 %v196_v3, %v195_v2  ;;  %v286_v46 = vstv %s285_s20  ;;  %s519_s4 = sshll.u32 %s606_s12, 4  ;;  %s520_s4 = int_to_ptr.vmem [resolvable:$false] %s519_s4 }
  0x32   : > { %p517_p11 = pnand %p516_p10, %p662_p4  ;;  %s521_s5 = scalar_lea.vmem %s520_s4, 32 }
  0x33   : > { %198 = vadd.xlane.f32.xlu0 %v197_v4  ;;  %p522_p0 = scmp.lt.s32.totalorder %s712_s26, %s520_s4  ;;  %p523_p1 = scmp.lt.s32.totalorder %s521_s5, %s515_s3 }
  0x34   : > { %p518_p13 = pneg %p517_p11 }
  0x35   : > { %p524_p2 = por %p523_p1, %p522_p0 }
  0x37   : > { %p525_p3 = pnand %p524_p2, %p518_p13 }
  0xc0   : > { %v199_v18 = vpop.xlane.xlu0 %198 }
  0xc1   : > { %v204_v20 = vrot.slane %v199_v18, %v203_v14  ;;  %v208_v21 = vrot.slane %v199_v18, %v207_v15  ;;  %v212_v22 = vrot.slane %v199_v18, %v211_v16  ;;  %v216_v23 = vrot.slane %v199_v18, %v215_v17 }
  0xc3   : > { %v217_v24 = vcombine.low %v204_v20, %v208_v21  ;;  %v218_v25 = vcombine.low %v212_v22, %v216_v23 }
  0xc5   : > { %v225_v26 = vrot.slane %v217_v24, %v224_v19  ;;  %v232_v27 = vrot.slane %v218_v25, %v224_v19 }
  0xc7   : > { %v233_v28 = vcombine.low %v225_v26, %v232_v27 }
  0xc9   : > { %v240_v29 = vrot.slane %v233_v28, %v224_v19 }
  0xcb   : > { %242 = vperm.xlu0 %494, %v240_v29  }
 0x14a   : > { %v243_v30 = vpop.permute.xlu0 %242 }
 0x14b   : > { %v249_v31 = vrot.slane %v243_v30, %v248_v10 }
 0x14d   : > { %v256_v32 = vrot.slane %v249_v31, %v224_v19 }
 0x14f   : > { %v263_v34 = vrot.slane %v256_v32, %v224_v19 }
 0x151   : > { %v265_v35 = vadd.f32 %v263_v34, %v190_v33 }
 0x153   : > { %267 = vst.msk [vmem:[#allocation2] sm:$0x1] %vm187_vm1, %v265_v35 }
 0x15a   : > { %v271_v36 = vld [vmem:[#allocation2] sm:$0x1] }
 0x15b   : > { %v272_v37 = vmul.f32 0.00390625, %v271_v36 }
 0x15d   : > { %v277_v38 = vrot.slane %v272_v37, %v203_v14 }
 0x15f   : > { %278 = vrot.lane.b32.xlu1 %v277_v38, %s603_s7 }
 0x1d1   : > { %v279_v40 = vpop.permute.xlu1 %278 }
 0x1d2   : > { %v282_v41 = vsel %vm281_vm2, 0.0, %v279_v40 }
 0x1d3   : > { %v284_v42 = vsel %vm283_vm3, %v282_v41, 0.0 }
 0x1d4   : > { %v291_v43 = vmul.f32 %v290_v39, %v284_v42  ;;  %v299_v45 = vmul.f32 %v298_v44, %v284_v42  ;;  %v287_v48 = vmul.f32 %v286_v46, %v284_v42 }
 0x1d6   : > { %293 = vrot.lane.b32.xlu1 %v291_v43, %s604_s16 }
 0x1da   : > { %301 = vrot.lane.b32.xlu1 %v299_v45, %s605_s18 }
 0x248   : > { %v294_v47 = vpop.permute.xlu1 %293 }
 0x249   : > { %v296_v49 = vadd.f32 %v294_v47, %v287_v48 }
 0x24c   : > { %v302_v50 = vpop.permute.xlu1 %301 }
 0x24d   : > { %v304_v51 = vadd.f32 %v302_v50, %v296_v49 }
 0x24f   : > { %v417_v52 = vmul.f32 -1.442695, %v304_v51 }
 0x251   : > { %496 = vpow2.f32 %v417_v52 }
 0x25b   : > { %v497_v53 = vpop.eup %496 }
 0x25c   : > { %v308_v54 = vadd.f32 1.0, %v497_v53 }
 0x25e   : > { %498 = vrcp.f32 %v308_v54 }
 0x268   : > { %v499_v55 = vpop.eup %498 }
 0x269   : > { %311 = vst.msk [vmem:[%s172_s25] sm:$0x1] %vm187_vm1, %v499_v55 }
 0x26a   : > { %528 = shalt.err (!%p525_p3)
}
 0x26b   : > { %s529_s6 = scalar_lea.hbm %s710_s29, 16  ;;  %s533_s15 = scalar_lea.hbm %s760_s2, 32 }
 0x26c   : > { %p530_p5 = scmp.ne.s32.totalorder %s710_s29, %s529_s6  ;;  %p534_p9 = scmp.lt.u32.totalorder %s710_s29, %s760_s2 }
 0x26d   : > { %p535_p12 = scmp.lt.u32.totalorder %s533_s15, %s529_s6  ;;  %p537_p11 = scmp.lt.u32.totalorder %s529_s6, %s710_s29 }
 0x26e   : > { %p531_p6 = pnand %p530_p5, %p662_p4 }
 0x26f   : > { %p536_p10 = por %p535_p12, %p534_p9 }
 0x270   : > { %p532_p7 = pneg %p531_p6 }
 0x271   : > { %p538_p13 = por %p537_p11, %p536_p10 }
 0x273   : > { %p539_p0 = pnand %p538_p13, %p532_p7 }
 0x275   : > { %542 = shalt.err (!%p539_p0)
}
 0x276   : > { %426 = dma.vmem_to_hbm [thread:$0]  (%p662_p4), %s712_s26, 16, %s710_s29, %s313_s30  }
 0x277 PF: > { %p438_p1 = scmp.ge.s32.totalorder %s597_s14, 2  ;;  %s337_s20 = sand.u32 1, %s577_s9  }
 0x278   : > { %s338_s23 = scalar_lea.sflag [#allocation4], %s337_s20 }
 0x279   : > { %p433_p2 = pnand %p438_p1, %p669_p8 }
 0x27b   : > { %572 = dma.done.wait (!%p433_p2), %s338_s23, 16  }
 0x27c   : > { %574 = vsyncadd (!%p433_p2), %s338_s23, 4294967280  ;;  %s16_s14 = sadd.s32 1, %s597_s14   ;;  %s765_s9 = smov %s581_s10 }
 0x27d   : > { %p13_p3 = scmp.ge.s32.totalorder %s16_s14, 4   ;;  %s766_s10 = smov %s585_s11 }
 0x27e   : > { %s767_s11 = smov %s675_s22  ;;  %s768_s12 = smov %s593_s13 }
 0x27f   : > { %s769_s13 = smov %s771_s17  ;;  %15 = sbr.rel (!%p13_p3) target bundleno = 5 (0x5), region = 76 }
 0x286   :  { %342 = vsyncpa [#allocation4], 1 }
 0x287   :  { %344 = vsyncpa [#allocation4 + $0x1], 1 }
 0x288   :  { %345 = vsyncpa [#allocation5], 1 }
 0x289   :  { %347 = vsyncpa [#allocation5 + $0x1], 1 }

</bundles_post_ra>
